<compile_context>
chip_gen: v6e
topology: v6e:2x2x1
jax: 0.10.0
libtpu: 0.0.40
codegen_flags: <defaults>
</compile_context>

<pallas_src>
import functools

import jax
import jax.numpy as jnp
from jax import lax
from jax.experimental import pallas as pl
from jax.experimental.pallas import tpu as pltpu


def attention_kernel(x_ref, w_ref, b_ref, gamma_ref, o_ref, *, eps):
    # x_ref block: (Bt, C, N); w_ref: (O, C) bf16 stacked [q_pad; k_pad; v];
    # b_ref: (O, 1) f32 stacked biases; gamma_ref: (1, 1) scalar in SMEM.
    bt, c, n = x_ref.shape
    o = w_ref.shape[0]
    mp = (o - c) // 2                      # padded q/k row count (multiple of 8)

    gamma = gamma_ref[0, 0]
    w = w_ref[...]                         # (O, C) bf16
    bias = b_ref[...]                      # (O, 1) f32

    for bi in range(bt):                   # bt is small and static (unrolled)
        x = x_ref[bi]                      # (C, N) f32

        # Stacked 1x1 convolutions: single MXU matmul (bf16 inputs, f32 accumulation).
        qkv = jnp.dot(w, x.astype(jnp.bfloat16),
                      preferred_element_type=jnp.float32) + bias        # (O, N)
        q = qkv[:mp]                       # (Mp, N); rows >= M are exactly 0
        k = qkv[mp:2 * mp]                 # (Mp, N)
        v = qkv[2 * mp:]                   # (C, N)

        # l2 norm over the channel axis (torch dim=-2), per spatial position.
        # rsqrt runs on the EUP; zero-padded rows contribute 0 and stay 0.
        qn = q * lax.rsqrt(jnp.sum(q * q, axis=0, keepdims=True))        # (Mp, N)
        kn = k * lax.rsqrt(jnp.sum(k * k, axis=0, keepdims=True))        # (Mp, N)

        # tailor[n] = 1 / (N + sum_m qn[m,n] * (sum_n kn[m,n] + eps))
        # (padded qn rows are 0, so their eps offsets contribute nothing.)
        k_rowsum = jnp.sum(kn, axis=1, keepdims=True) + eps              # (Mp, 1)
        denom = jnp.float32(n) + jnp.sum(qn * k_rowsum, axis=0, keepdims=True)
        tailor_g = gamma * pl.reciprocal(denom, approx=True)             # (1, N), EUP

        value_sum = jnp.sum(v, axis=1, keepdims=True)                    # (C, 1)

        # matrix[m, c] = sum_n kn[m,n] * v[c,n]   (bf16 MXU, f32 accumulation)
        matrix = lax.dot_general(kn.astype(jnp.bfloat16), v.astype(jnp.bfloat16),
                                 (((1,), (1,)), ((), ())),
                                 preferred_element_type=jnp.float32)     # (Mp, C)
        # attn[c, n] = sum_m matrix[m,c] * qn[m,n]; contraction depth Mp is tiny, so the
        # MXU is under-filled, but one push keeps lowering simple; the epilogue below is
        # fused into a single VPU pass (gamma already folded into tailor_g).
        attn = lax.dot_general(matrix, qn, (((0,), (0,)), ((), ())),
                               preferred_element_type=jnp.float32)       # (C, N)

        o_ref[bi] = ((value_sum + attn) * tailor_g).astype(o_ref.dtype)


def _pick_batch_tile(batch, c, n, max_tile=8, vmem_budget_bytes=16 << 20):
    """Largest divisor of `batch` (<= max_tile) that leaves >= 2 grid steps and fits VMEM."""
    per_elem_bytes = 2 * 2 * c * n * 4     # x + out blocks, double-buffered, f32
    best = 1
    for bt in range(2, min(batch, max_tile) + 1):
        if (batch % bt == 0 and batch // bt >= 2
                and bt * per_elem_bytes <= vmem_budget_bytes):
            best = bt
    return best


def attention_forward(x_nchw, params, *, eps=1e-6, batch_tile=None):
    B, C, W, H = x_nchw.shape
    N = W * H
    M = params["wq"].shape[0]
    Mp = ((M + 7) // 8) * 8                 # pad q/k rows to a sublane multiple of 8
    O = 2 * Mp + C

    def pad_rows(a, rows):
        return jnp.pad(a, ((0, rows - a.shape[0]), (0, 0)))

    # Stack [q_pad; k_pad; v] projection weights (bf16 for the MXU) and biases (f32).
    w_stack = jnp.concatenate(
        [pad_rows(params["wq"], Mp), pad_rows(params["wk"], Mp), params["wv"]],
        axis=0).astype(jnp.bfloat16)                                     # (O, C)
    b_stack = jnp.concatenate(
        [pad_rows(params["bq"], Mp), pad_rows(params["bk"], Mp), params["bv"]],
        axis=0).astype(jnp.float32)                                      # (O, 1)

    if batch_tile is None:
        batch_tile = _pick_batch_tile(B, C, N)
    assert B % batch_tile == 0, (B, batch_tile)
    grid = (B // batch_tile,)

    x_flat = x_nchw.reshape(B, C, N)
    gamma = params["gamma"].reshape(1, 1).astype(jnp.float32)

    kernel = functools.partial(attention_kernel, eps=eps)

    # TODO(synk): for large C*N (e.g. C=512, N=4096) the full-N-resident blocks exceed
    # v7x's 64 MiB VMEM; an N-tiled two-pass variant (accumulate k_rowsum / value_sum /
    # matrix, then stream the output) would be required there.
    # TODO(synk): if W*H is not a multiple of 128, pad/mask N to keep stores lane-dense
    # (matters most on v5e's single vector-store slot).
    out_flat = pl.pallas_call(
        kernel,
        out_shape=jax.ShapeDtypeStruct((B, C, N), x_nchw.dtype),
        grid_spec=pltpu.PrefetchScalarGridSpec(
            num_scalar_prefetch=0,
            grid=grid,
            in_specs=[
                pl.BlockSpec((batch_tile, C, N), lambda b: (b, 0, 0)),    # x
                pl.BlockSpec((O, C), lambda b: (0, 0)),                    # stacked weights
                pl.BlockSpec((O, 1), lambda b: (0, 0)),                    # stacked biases
                pl.BlockSpec(memory_space=pltpu.MemorySpace.SMEM),         # gamma scalar
            ],
            out_specs=pl.BlockSpec((batch_tile, C, N), lambda b: (b, 0, 0)),
        ),
        compiler_params=pltpu.CompilerParams(
            dimension_semantics=("parallel",)),
    )(x_flat, w_stack, b_stack, gamma)

    # torch: weight_value.view(batch, channels, height, width)
    return out_flat.reshape(B, C, H, W)


def attention_ref(x_nchw, params, eps=1e-6):
    """Pure-JAX f32 reference mirroring the PyTorch forward exactly."""
    B, C, W, H = x_nchw.shape
    N = W * H
    x = x_nchw.reshape(B, C, N).astype(jnp.float32)
    q = jnp.einsum('mc,bcn->bmn', params["wq"], x) + params["bq"][None]
    k = jnp.einsum('mc,bcn->bmn', params["wk"], x) + params["bk"][None]
    v = jnp.einsum('oc,bcn->bon', params["wv"], x) + params["bv"][None]
    qn = q / jnp.linalg.norm(q, axis=-2, keepdims=True)
    kn = k / jnp.linalg.norm(k, axis=-2, keepdims=True)
    qt = jnp.transpose(qn, (0, 2, 1))                                     # (B, N, M)
    tailor = 1.0 / (N + jnp.einsum('bnm,bm->bn', qt, jnp.sum(kn, -1) + eps))
    value_sum = jnp.sum(v, -1)[:, :, None]                                # (B, C, 1)
    matrix = jnp.einsum('bmn,bcn->bmc', kn, v)
    matrix_sum = value_sum + jnp.einsum('bnm,bmc->bcn', qt, matrix)
    out = matrix_sum * tailor[:, None, :]
    return (params["gamma"].reshape(()) * out).reshape(B, C, H, W)


if __name__ == "__main__":
    key = jax.random.PRNGKey(0)
    in_places, scale = 32, 8
    B, C, W, H = 4, in_places, 16, 16
    M = in_places // scale
    ks = jax.random.split(key, 7)

    x = jax.random.normal(ks[0], (B, C, W, H), jnp.float32)
    params = {
        # Conv2d(in_places, in_places//scale, 1) weights -> (out_c, in_c), biases -> (out_c, 1)
        "wq": 0.1 * jax.random.normal(ks[1], (M, C), jnp.float32),
        "bq": 0.1 * jax.random.normal(ks[2], (M, 1), jnp.float32),
        "wk": 0.1 * jax.random.normal(ks[3], (M, C), jnp.float32),
        "bk": 0.1 * jax.random.normal(ks[4], (M, 1), jnp.float32),
        "wv": 0.1 * jax.random.normal(ks[5], (C, C), jnp.float32),
        "bv": 0.1 * jax.random.normal(ks[6], (C, 1), jnp.float32),
        # nn.Parameter(torch.zeros(1)) -> module output is identically zero at init
        "gamma": jnp.zeros((1, 1), jnp.float32),
    }

    out = attention_forward(x, params)
    jax.block_until_ready(out)
    assert out.shape == (B, C, H, W)
    assert float(jnp.max(jnp.abs(out))) == 0.0   # gamma == 0 at init, as in PyTorch

    # Exercise the full pipeline numerically with a nonzero gamma (test-harness only).
    # Tolerance accounts for bf16 MXU inputs + approx reciprocal vs. the f32 reference.
    params_test = dict(params, gamma=jnp.ones((1, 1), jnp.float32))
    out_t = jax.block_until_ready(attention_forward(x, params_test))
    ref_t = attention_ref(x, params_test)
    max_err = float(jnp.max(jnp.abs(out_t - ref_t)))
    assert jnp.allclose(out_t, ref_t, atol=2e-2, rtol=2e-2), max_err

    print("KERNEL_OK")
</pallas_src>

<mosaic_0001>
module attributes {stable_mosaic.version = 11 : i64} {
  func.func @attention_kernel(%arg0: i32, %arg1: memref<2x32x256xf32, #tpu.memory_space<vmem>>, %arg2: memref<48x32xbf16, #tpu.memory_space<vmem>>, %arg3: memref<48x1xf32, #tpu.memory_space<vmem>>, %arg4: memref<1x1xf32, #tpu.memory_space<smem>>, %arg5: memref<2x32x256xf32, #tpu.memory_space<vmem>>) attributes {dimension_semantics = [#tpu.dimension_semantics<parallel>], iteration_bounds = array<i64: 2>, scalar_prefetch = 0 : i64, scratch_operands = 0 : i64, tpu.core_type = #tpu.core_type<tc>, window_params = [{transform_indices = @transform_0, window_bounds = array<i64: 2, 32, 256>}, {pipeline_mode = #tpu.pipeline_mode<synchronous>, transform_indices = @transform_1, window_bounds = array<i64: 48, 32>}, {pipeline_mode = #tpu.pipeline_mode<synchronous>, transform_indices = @transform_2, window_bounds = array<i64: 48, 1>}, {transform_indices = @transform_3, window_bounds = array<i64: 1, 1>}, {transform_indices = @transform_4, window_bounds = array<i64: 2, 32, 256>}]} {
    %c0 = arith.constant 0 : index
    %c0_0 = arith.constant 0 : index
    %0 = memref.load %arg4[%c0, %c0_0] : memref<1x1xf32, #tpu.memory_space<smem>>
    %c0_1 = arith.constant 0 : index
    %c0_2 = arith.constant 0 : index
    %1 = vector.load %arg2[%c0_1, %c0_2] : memref<48x32xbf16, #tpu.memory_space<vmem>>, vector<48x32xbf16>
    %c0_3 = arith.constant 0 : index
    %c0_4 = arith.constant 0 : index
    %2 = vector.load %arg3[%c0_3, %c0_4] : memref<48x1xf32, #tpu.memory_space<vmem>>, vector<48x1xf32>
    %c0_5 = arith.constant 0 : index
    %c0_6 = arith.constant 0 : index
    %c0_7 = arith.constant 0 : index
    %3 = vector.load %arg1[%c0_5, %c0_6, %c0_7] : memref<2x32x256xf32, #tpu.memory_space<vmem>>, vector<1x32x256xf32>
    %4 = vector.shape_cast %3 : vector<1x32x256xf32> to vector<32x256xf32>
    %5 = arith.truncf %4 : vector<32x256xf32> to vector<32x256xbf16>
    %cst = arith.constant dense<0.000000e+00> : vector<48x256xf32>
    %6 = tpu.matmul %1, %5, %cst {dimension_numbers = #tpu.dot_dimension_numbers<[1], [0], [0], [1], [0, 0, 1, 1], [], []>} : vector<48x32xbf16>, vector<32x256xbf16>, vector<48x256xf32> -> vector<48x256xf32>
    %7 = vector.broadcast %2 : vector<48x1xf32> to vector<48x256xf32>
    %8 = arith.addf %6, %7 : vector<48x256xf32>
    %9 = vector.extract_strided_slice %8 {offsets = [0, 0], sizes = [8, 256], strides = [1, 1]} : vector<48x256xf32> to vector<8x256xf32>
    %10 = vector.extract_strided_slice %8 {offsets = [8, 0], sizes = [8, 256], strides = [1, 1]} : vector<48x256xf32> to vector<8x256xf32>
    %11 = vector.extract_strided_slice %8 {offsets = [16, 0], sizes = [32, 256], strides = [1, 1]} : vector<48x256xf32> to vector<32x256xf32>
    %12 = arith.mulf %9, %9 : vector<8x256xf32>
    %cst_8 = arith.constant dense<0.000000e+00> : vector<256xf32>
    %13 = vector.multi_reduction <add>, %12, %cst_8 [0] : vector<8x256xf32> to vector<256xf32>
    %14 = vector.shape_cast %13 : vector<256xf32> to vector<1x256xf32>
    %15 = math.rsqrt %14 : vector<1x256xf32>
    %16 = vector.broadcast %15 : vector<1x256xf32> to vector<8x256xf32>
    %17 = arith.mulf %9, %16 : vector<8x256xf32>
    %18 = arith.mulf %10, %10 : vector<8x256xf32>
    %cst_9 = arith.constant dense<0.000000e+00> : vector<256xf32>
    %19 = vector.multi_reduction <add>, %18, %cst_9 [0] : vector<8x256xf32> to vector<256xf32>
    %20 = vector.shape_cast %19 : vector<256xf32> to vector<1x256xf32>
    %21 = math.rsqrt %20 : vector<1x256xf32>
    %22 = vector.broadcast %21 : vector<1x256xf32> to vector<8x256xf32>
    %23 = arith.mulf %10, %22 : vector<8x256xf32>
    %cst_10 = arith.constant dense<0.000000e+00> : vector<8xf32>
    %24 = vector.multi_reduction <add>, %23, %cst_10 [1] : vector<8x256xf32> to vector<8xf32>
    %25 = vector.shape_cast %24 : vector<8xf32> to vector<8x1xf32>
    %cst_11 = arith.constant 9.99999997E-7 : f32
    %26 = vector.broadcast %cst_11 : f32 to vector<8x1xf32>
    %27 = arith.addf %25, %26 : vector<8x1xf32>
    %28 = vector.broadcast %27 : vector<8x1xf32> to vector<8x256xf32>
    %29 = arith.mulf %17, %28 : vector<8x256xf32>
    %cst_12 = arith.constant dense<0.000000e+00> : vector<256xf32>
    %30 = vector.multi_reduction <add>, %29, %cst_12 [0] : vector<8x256xf32> to vector<256xf32>
    %31 = vector.shape_cast %30 : vector<256xf32> to vector<1x256xf32>
    %cst_13 = arith.constant 2.560000e+02 : f32
    %32 = vector.broadcast %cst_13 : f32 to vector<1x256xf32>
    %33 = arith.addf %32, %31 : vector<1x256xf32>
    %34 = tpu.reciprocal %33 {approx = true} : vector<1x256xf32> -> vector<1x256xf32>
    %35 = vector.broadcast %0 : f32 to vector<1x256xf32>
    %36 = arith.mulf %35, %34 : vector<1x256xf32>
    %cst_14 = arith.constant dense<0.000000e+00> : vector<32xf32>
    %37 = vector.multi_reduction <add>, %11, %cst_14 [1] : vector<32x256xf32> to vector<32xf32>
    %38 = vector.shape_cast %37 : vector<32xf32> to vector<32x1xf32>
    %39 = arith.truncf %23 : vector<8x256xf32> to vector<8x256xbf16>
    %40 = arith.truncf %11 : vector<32x256xf32> to vector<32x256xbf16>
    %cst_15 = arith.constant dense<0.000000e+00> : vector<8x32xf32>
    %41 = tpu.matmul %39, %40, %cst_15 {dimension_numbers = #tpu.dot_dimension_numbers<[1], [1], [0], [0], [0, 0, 1, 0], [], []>} : vector<8x256xbf16>, vector<32x256xbf16>, vector<8x32xf32> -> vector<8x32xf32>
    %cst_16 = arith.constant dense<0.000000e+00> : vector<32x256xf32>
    %42 = tpu.matmul %41, %17, %cst_16 {dimension_numbers = #tpu.dot_dimension_numbers<[0], [0], [1], [1], [0, 1, 1, 1], [], []>} : vector<8x32xf32>, vector<8x256xf32>, vector<32x256xf32> -> vector<32x256xf32>
    %43 = vector.broadcast %38 : vector<32x1xf32> to vector<32x256xf32>
    %44 = arith.addf %43, %42 : vector<32x256xf32>
    %45 = vector.broadcast %36 : vector<1x256xf32> to vector<32x256xf32>
    %46 = arith.mulf %44, %45 : vector<32x256xf32>
    %c0_17 = arith.constant 0 : index
    %c0_18 = arith.constant 0 : index
    %c0_19 = arith.constant 0 : index
    %47 = vector.load %arg5[%c0_17, %c0_18, %c0_19] : memref<2x32x256xf32, #tpu.memory_space<vmem>>, vector<1x32x256xf32>
    %48 = vector.shape_cast %47 : vector<1x32x256xf32> to vector<32x256xf32>
    %49 = vector.shape_cast %46 : vector<32x256xf32> to vector<1x32x256xf32>
    tpu.vector_store %arg5[%c0_17, %c0_18, %c0_19], %49 {strides = array<i32>} : memref<2x32x256xf32, #tpu.memory_space<vmem>>, vector<1x32x256xf32>,
    %c1 = arith.constant 1 : index
    %c0_20 = arith.constant 0 : index
    %c0_21 = arith.constant 0 : index
    %50 = vector.load %arg1[%c1, %c0_20, %c0_21] : memref<2x32x256xf32, #tpu.memory_space<vmem>>, vector<1x32x256xf32>
    %51 = vector.shape_cast %50 : vector<1x32x256xf32> to vector<32x256xf32>
    %52 = arith.truncf %51 : vector<32x256xf32> to vector<32x256xbf16>
    %cst_22 = arith.constant dense<0.000000e+00> : vector<48x256xf32>
    %53 = tpu.matmul %1, %52, %cst_22 {dimension_numbers = #tpu.dot_dimension_numbers<[1], [0], [0], [1], [0, 0, 1, 1], [], []>} : vector<48x32xbf16>, vector<32x256xbf16>, vector<48x256xf32> -> vector<48x256xf32>
    %54 = vector.broadcast %2 : vector<48x1xf32> to vector<48x256xf32>
    %55 = arith.addf %53, %54 : vector<48x256xf32>
    %56 = vector.extract_strided_slice %55 {offsets = [0, 0], sizes = [8, 256], strides = [1, 1]} : vector<48x256xf32> to vector<8x256xf32>
    %57 = vector.extract_strided_slice %55 {offsets = [8, 0], sizes = [8, 256], strides = [1, 1]} : vector<48x256xf32> to vector<8x256xf32>
    %58 = vector.extract_strided_slice %55 {offsets = [16, 0], sizes = [32, 256], strides = [1, 1]} : vector<48x256xf32> to vector<32x256xf32>
    %59 = arith.mulf %56, %56 : vector<8x256xf32>
    %cst_23 = arith.constant dense<0.000000e+00> : vector<256xf32>
    %60 = vector.multi_reduction <add>, %59, %cst_23 [0] : vector<8x256xf32> to vector<256xf32>
    %61 = vector.shape_cast %60 : vector<256xf32> to vector<1x256xf32>
    %62 = math.rsqrt %61 : vector<1x256xf32>
    %63 = vector.broadcast %62 : vector<1x256xf32> to vector<8x256xf32>
    %64 = arith.mulf %56, %63 : vector<8x256xf32>
    %65 = arith.mulf %57, %57 : vector<8x256xf32>
    %cst_24 = arith.constant dense<0.000000e+00> : vector<256xf32>
    %66 = vector.multi_reduction <add>, %65, %cst_24 [0] : vector<8x256xf32> to vector<256xf32>
    %67 = vector.shape_cast %66 : vector<256xf32> to vector<1x256xf32>
    %68 = math.rsqrt %67 : vector<1x256xf32>
    %69 = vector.broadcast %68 : vector<1x256xf32> to vector<8x256xf32>
    %70 = arith.mulf %57, %69 : vector<8x256xf32>
    %cst_25 = arith.constant dense<0.000000e+00> : vector<8xf32>
    %71 = vector.multi_reduction <add>, %70, %cst_25 [1] : vector<8x256xf32> to vector<8xf32>
    %72 = vector.shape_cast %71 : vector<8xf32> to vector<8x1xf32>
    %cst_26 = arith.constant 9.99999997E-7 : f32
    %73 = vector.broadcast %cst_26 : f32 to vector<8x1xf32>
    %74 = arith.addf %72, %73 : vector<8x1xf32>
    %75 = vector.broadcast %74 : vector<8x1xf32> to vector<8x256xf32>
    %76 = arith.mulf %64, %75 : vector<8x256xf32>
    %cst_27 = arith.constant dense<0.000000e+00> : vector<256xf32>
    %77 = vector.multi_reduction <add>, %76, %cst_27 [0] : vector<8x256xf32> to vector<256xf32>
    %78 = vector.shape_cast %77 : vector<256xf32> to vector<1x256xf32>
    %cst_28 = arith.constant 2.560000e+02 : f32
    %79 = vector.broadcast %cst_28 : f32 to vector<1x256xf32>
    %80 = arith.addf %79, %78 : vector<1x256xf32>
    %81 = tpu.reciprocal %80 {approx = true} : vector<1x256xf32> -> vector<1x256xf32>
    %82 = vector.broadcast %0 : f32 to vector<1x256xf32>
    %83 = arith.mulf %82, %81 : vector<1x256xf32>
    %cst_29 = arith.constant dense<0.000000e+00> : vector<32xf32>
    %84 = vector.multi_reduction <add>, %58, %cst_29 [1] : vector<32x256xf32> to vector<32xf32>
    %85 = vector.shape_cast %84 : vector<32xf32> to vector<32x1xf32>
    %86 = arith.truncf %70 : vector<8x256xf32> to vector<8x256xbf16>
    %87 = arith.truncf %58 : vector<32x256xf32> to vector<32x256xbf16>
    %cst_30 = arith.constant dense<0.000000e+00> : vector<8x32xf32>
    %88 = tpu.matmul %86, %87, %cst_30 {dimension_numbers = #tpu.dot_dimension_numbers<[1], [1], [0], [0], [0, 0, 1, 0], [], []>} : vector<8x256xbf16>, vector<32x256xbf16>, vector<8x32xf32> -> vector<8x32xf32>
    %cst_31 = arith.constant dense<0.000000e+00> : vector<32x256xf32>
    %89 = tpu.matmul %88, %64, %cst_31 {dimension_numbers = #tpu.dot_dimension_numbers<[0], [0], [1], [1], [0, 1, 1, 1], [], []>} : vector<8x32xf32>, vector<8x256xf32>, vector<32x256xf32> -> vector<32x256xf32>
    %90 = vector.broadcast %85 : vector<32x1xf32> to vector<32x256xf32>
    %91 = arith.addf %90, %89 : vector<32x256xf32>
    %92 = vector.broadcast %83 : vector<1x256xf32> to vector<32x256xf32>
    %93 = arith.mulf %91, %92 : vector<32x256xf32>
    %c1_32 = arith.constant 1 : index
    %c0_33 = arith.constant 0 : index
    %c0_34 = arith.constant 0 : index
    %94 = vector.load %arg5[%c1_32, %c0_33, %c0_34] : memref<2x32x256xf32, #tpu.memory_space<vmem>>, vector<1x32x256xf32>
    %95 = vector.shape_cast %94 : vector<1x32x256xf32> to vector<32x256xf32>
    %96 = vector.shape_cast %93 : vector<32x256xf32> to vector<1x32x256xf32>
    tpu.vector_store %arg5[%c1_32, %c0_33, %c0_34], %96 {strides = array<i32>} : memref<2x32x256xf32, #tpu.memory_space<vmem>>, vector<1x32x256xf32>,
    return
  }
  func.func @transform_0(%arg0: i32) -> (i32, i32, i32) {
    %c0_i32 = arith.constant 0 : i32
    %c0_i32_0 = arith.constant 0 : i32
    %c0_i32_1 = arith.constant 0 : i32
    return %arg0, %c0_i32, %c0_i32_0 : i32, i32, i32
  }
  func.func @transform_1(%arg0: i32) -> (i32, i32) {
    %c0_i32 = arith.constant 0 : i32
    %c0_i32_0 = arith.constant 0 : i32
    %c0_i32_1 = arith.constant 0 : i32
    return %c0_i32, %c0_i32_0 : i32, i32
  }
  func.func @transform_2(%arg0: i32) -> (i32, i32) {
    %c0_i32 = arith.constant 0 : i32
    %c0_i32_0 = arith.constant 0 : i32
    %c0_i32_1 = arith.constant 0 : i32
    return %c0_i32, %c0_i32_0 : i32, i32
  }
  func.func @transform_3(%arg0: i32) -> (i32, i32) {
    %c0_i32 = arith.constant 0 : i32
    %c0_i32_0 = arith.constant 0 : i32
    %c0_i32_1 = arith.constant 0 : i32
    return %c0_i32, %c0_i32_0 : i32, i32
  }
  func.func @transform_4(%arg0: i32) -> (i32, i32, i32) {
    %c0_i32 = arith.constant 0 : i32
    %c0_i32_0 = arith.constant 0 : i32
    %c0_i32_1 = arith.constant 0 : i32
    return %arg0, %c0_i32, %c0_i32_0 : i32, i32, i32
  }
}

</mosaic_0001>

<bundles_post_ra>
// kernel: tpu_custom_call.1
= control target key start
LH: loop header
LB: loop body
LE: loop exit
PB: predicated region body
PF: predicated region fallthrough
CT: control target
= control target key end

     0   :  { %s1739_s0 = inlined_call_operand.hbm [shape: f32[4,32,256], index: 0, kind: input, shape index: {}]   ;;  %s1740_s1 = inlined_call_operand.vmem [shape: bf16[48,32], index: 1, kind: input, shape index: {}]   ;;  %s1741_s2 = inlined_call_operand.vmem [shape: f32[48,1], index: 2, kind: input, shape index: {}]   ;;  %s1742_s3 = inlined_call_operand.<no memory space> [shape: f32[1,1], index: 3, kind: input, shape index: {}]   ;;  %s1743_s4 = inlined_call_operand.hbm [shape: f32[4,32,256], index: 4, kind: output, shape index: {}]  }
   0x1   :  { %9 = sst [smem:[#allocation2]] %s1742_s3 }
   0x2   :  { %10 = vsyncpa [#allocation4], 0 }
   0x3   :  { %12 = vsyncpa [#allocation4 + $0x1], 0 }
   0x4   :  { %13 = vsyncpa [#allocation5], 0 }
   0x5   :  { %15 = vsyncpa [#allocation5 + $0x1], 0  ;;  %s1347_s17 = smov 0   ;;  %s1349_s18 = smov 0  }
   0x6   :  { %s1351_s19 = smov 0   ;;  %s1353_s20 = smov 0  }
   0x7 LB: > { %s1368_s3 = sadd.s32 4294967295, %s1309_s20   ;;  %s1081_s21 = sadd.s32 4294967294, %s1309_s20   ;;  %s1309_s20 = sphi %s1353_s20, %s1758_s20   ;;  %s1305_s19 = sphi %s1351_s19, %s1757_s19   ;;  %s1301_s18 = sphi %s1349_s18, %s1756_s18   ;;  %s1297_s17 = sphi %s1347_s17, %s1755_s17  }
   0x8   : > { %s1372_s22 = sadd.s32 1, %s1309_s20   ;;  %s28_s23 = sadd.s32 1, %s1305_s19 }
   0x9   : > { %s25_s24 = ssub.s32 %s1309_s20, %s1372_s22  ;;  %p35_p0 = scmp.ne.s32.totalorder %s1305_s19, %s1301_s18 }
   0xa   : > { %p26_p1 = scmp.eq.s32.totalorder %s25_s24, 0  ;;  %p36_p2 = scmp.eq.s32.totalorder %s1309_s20, 0 }
   0xb   : > { %p41_p3 = scmp.ne.s32.totalorder %s1301_s18, %s1297_s17  ;;  %p42_p4 = scmp.eq.s32.totalorder %s1368_s3, 0 }
   0xc   : > { %s1384_s25 = scalar_select %p26_p1, %s1305_s19, %s28_s23  }
   0xd   : > { %p1386_p5 = por %p36_p2, %p35_p0  ;;  %p1390_p6 = por %p42_p4, %p41_p3 }
   0xe   : > { %p128_p7 = scmp.eq.s32.totalorder %s1368_s3, 1  ;;  %p134_p8 = scmp.eq.s32.totalorder %s1081_s21, 1 }
   0xf   : > { %s1747_s27 = scalar_select %p1390_p6, 1, 0 }
  0x10   : > { %p1148_p10 = scmp.lt.s32.totalorder %s1309_s20, 2  ;;  %p1397_p11 = por %p128_p7, %p35_p0 }
  0x11   : > { %p1401_p12 = por %p134_p8, %p41_p3  ;;  %s163_s30 = sand.u32 1, %s1305_s19  }
  0x12   : > { %s1748_s28 = scalar_select %p1397_p11, 1, 0 }
  0x13   : > { %s1749_s29 = scalar_select %p1401_p12, 1, 0 }
  0x14   : > { %s1131_s5 = sshll.u32 %s1309_s20, 11  ;;  %s1084_s6 = sshll.u32 %s163_s30, 7 }
  0x15   : > { %s1410_s9 = scalar_lea.hbm %s1739_s0, %s1131_s5  ;;  %s167_s10 = scalar_lea.vmem [#allocation3], %s1084_s6 }
  0x16   : > { %s175_s11 = sshll.u32 %s167_s10, 4  ;;  %p1414_p13 = pnand %p1148_p10, %p1386_p5  ;;  %s1418_s11 = int_to_ptr.vmem [resolvable:$true] %s175_s11 }
  0x17   : > { %s1420_s13 = scalar_lea.sflag [#allocation4], %s163_s30  ;;  %s1217_s14 = scalar_lea.hbm %s1410_s9, 2048 }
  0x18   : > { %p1218_p0 = scmp.ne.s32.totalorder %s1410_s9, %s1217_s14  ;;  %p1219_p1 = pneg %p1414_p13 }
  0x19   : > { %s1222_s21 = scalar_lea.hbm %s1739_s0, 4096  ;;  %p1223_p4 = scmp.lt.s32.totalorder %s1410_s9, %s1739_s0 }
  0x1a   : > { %p1220_p2 = pnand %p1219_p1, %p1218_p0  ;;  %p1224_p5 = scmp.lt.s32.totalorder %s1222_s21, %s1217_s14 }
  0x1c   : > { %p1221_p3 = pneg %p1220_p2  ;;  %p1225_p7 = por %p1224_p5, %p1223_p4 }
  0x1e   : > { %p1226_p8 = pnand %p1225_p7, %p1221_p3 }
  0x20   : > { %1229 = shalt.err (!%p1226_p8)
}
  0x21   : > { %s1230_s26 = scalar_lea.vmem %s1418_s11, 2048  ;;  %s1311_s30 = smov [#allocation3]  }
  0x22   : > { %p1231_p10 = scmp.ne.s32.totalorder %s1418_s11, %s1230_s26  ;;  %s1235_s5 = sshll.u32 %s1311_s30, 4  ;;  %s1236_s5 = int_to_ptr.vmem [resolvable:$false] %s1235_s5 }
  0x23   : > { %s1237_s6 = scalar_lea.vmem %s1236_s5, 4096  ;;  %p1238_p2 = scmp.lt.s32.totalorder %s1418_s11, %s1236_s5 }
  0x24   : > { %p1233_p9 = pnand %p1231_p10, %p1219_p1  ;;  %p1239_p12 = scmp.lt.s32.totalorder %s1237_s6, %s1230_s26 }
  0x26   : > { %p1234_p0 = pneg %p1233_p9  ;;  %p1240_p11 = por %p1239_p12, %p1238_p2 }
  0x28   : > { %p1241_p6 = pnand %p1240_p11, %p1234_p0 }
  0x2a   : > { %1244 = shalt.err (!%p1241_p6)
}
  0x2b   : > { %s1312_s7 = smov 256   ;;  %s1313_s8 = smov 16  }
  0x2c   : > { %1143 = dma.hbm_to_vmem [thread:$0]  (!%p1414_p13), %s1410_s9, 2048, %s1418_s11, %s1420_s13, %s1312_s7, %s1312_s7, %s1313_s8  }
  0x2d   : > { %p1088_p9 = scmp.ge.s32.totalorder %s1309_s20, 1  ;;  %p183_p1 = scmp.lt.s32.totalorder %s1309_s20, 3 }
  0x2f   : > { %p184_p3 = pnand %p1088_p9, %p183_p1 }
  0x30   : > { %s1444_s10 = sand.u32 (!%p184_p3), 1, %s1301_s18   ;;  %p1751_p6 = scmp.ne.s32.totalorder (!%p184_p3), %s1747_s27, 0 }
  0x31   : > { %187 = sbr.rel (%p184_p3) target bundleno = 1178 (0x49a), region = 36  ;;  %s1089_s14 = sshll.u32 (!%p184_p3), %s1444_s10, 7 }
  0x32   : > { %s190_s15 = scalar_lea.sflag (!%p184_p3), [#allocation4], %s1444_s10  ;;  %s1450_s16 = scalar_lea.vmem (!%p184_p3), [#allocation3], %s1089_s14 }
  0x36   : > { %1288 = dma.done.wait (%p1751_p6), %s190_s15, 2048  }
  0x37   : > { %1290 = vsyncadd (%p1751_p6), %s190_s15, 4294965248  ;;  %v1314_v0 = vmov 0   ;;  %v239_v1 = vld [vmem:[%s1450_s16 + $0x28] sm:$0xff]  ;;  %v241_v2 = vld [vmem:[%s1450_s16 + $0x38] sm:$0xff]  ;;  %vm291_vm0 = vcmask 261120   ;;  %vm515_vm1 = vcmask 64512  }
  0x38   : > { %333 = vmatprep.mubr.bf16.mxu0 %v1314_v0  ;;  %1189 = vset.pattern.permute.xlu1 %v1314_v0  ;;  %v238_v3 = vld [vmem:[%s1450_s16 + $0x20] sm:$0xff]  ;;  %v245_v4 = vpack.c.bf16 %v241_v2, %v239_v1  ;;  %v240_v5 = vld [vmem:[%s1450_s16 + $0x30] sm:$0xff]  ;;  %v235_v6 = vld [vmem:[%s1450_s16 + $0x8] sm:$0xff]  ;;  %s221_s11 = sld [smem:[#allocation2]]  ;;  %s1657_s12 = scalar_lea.vmem [#allocation6], %s1089_s14 }
  0x39   : > { %1188 = vset.pattern.permute.xlu0 %v1314_v0  ;;  %v237_v7 = vld [vmem:[%s1450_s16 + $0x18] sm:$0xff]  ;;  %v244_v8 = vpack.c.bf16 %v240_v5, %v238_v3  ;;  %v234_v10 = vld [vmem:[%s1450_s16] sm:$0xff]  ;;  %v236_v11 = vld [vmem:[%s1450_s16 + $0x10] sm:$0xff]  ;;  %s1133_s14 = sshll.u32 %s1368_s3, 11  ;;  %s1008_s13 = sshll.u32 %s1657_s12, 4  ;;  %s1694_s13 = int_to_ptr.vmem [resolvable:$true] %s1008_s13 }
  0x3a   : > { %v243_v9 = vpack.c.bf16 %v237_v7, %v235_v6  ;;  %313 = vmatprep.subr.bf16.mxu0 %v245_v4  ;;  %v242_v12 = vpack.c.bf16 %v236_v11, %v234_v10  ;;  %v1106_v13 = vld [vmem:[%s1450_s16 + $0x68] sm:$0xff]  ;;  %v1108_v14 = vld [vmem:[%s1450_s16 + $0x78] sm:$0xff]  ;;  %v1105_v15 = vld [vmem:[%s1450_s16 + $0x60] sm:$0xff]  ;;  %s1692_s24 = scalar_lea.hbm %s1743_s4, %s1133_s14  ;;  %s994_s26 = scalar_lea.sflag [#allocation5], %s1444_s10 }
  0x3b   : > { %314 = vmatpush1.bf16.msra.mxu0 %v244_v8  ;;  %v1107_v16 = vld [vmem:[%s1450_s16 + $0x70] sm:$0xff]  ;;  %v1190_v17 = vld [vmem:[%s1740_s1] sm:$0xff]   ;;  %v653_v18 = vpack.c.bf16 %v1108_v14, %v1106_v13  ;;  %v1102_v19 = vld [vmem:[%s1450_s16 + $0x48] sm:$0xff]  ;;  %s1245_s3 = scalar_lea.vmem %s1694_s13, 2048  ;;  %p1752_p12 = scmp.ne.s32.totalorder %s1748_s28, 0 }
  0x3c   : > { %315 = vmatprep.subr.bf16.mxu0 %v243_v9  ;;  %v1104_v20 = vld [vmem:[%s1450_s16 + $0x58] sm:$0xff]  ;;  %v652_v21 = vpack.c.bf16 %v1107_v16, %v1105_v15  ;;  %v233_v22 = vld [vmem:[%s1741_s2 + $0x28] sm:$0xff]  ;;  %v1101_v24 = vld [vmem:[%s1450_s16 + $0x40] sm:$0xff]  ;;  %p1246_p11 = scmp.ne.s32.totalorder %s1694_s13, %s1245_s3  ;;  %s1316_s30 = smov [#allocation6]  }
  0x3d   : > { %v651_v23 = vpack.c.bf16 %v1104_v20, %v1102_v19  ;;  %v1103_v25 = vld [vmem:[%s1450_s16 + $0x50] sm:$0xff]  ;;  %273 = vperm.xlu1 %1189, %v233_v22   ;;  %v229_v26 = vld [vmem:[%s1741_s2 + $0x8] sm:$0xff]  ;;  %v232_v28 = vld [vmem:[%s1741_s2 + $0x20] sm:$0xff]  ;;  %s1249_s5 = sshll.u32 %s1316_s30, 4  ;;  %s1250_s5 = int_to_ptr.vmem [resolvable:$false] %s1249_s5 }
  0x3e   : > { %v230_v27 = vld [vmem:[%s1741_s2 + $0x10] sm:$0xff]  ;;  %253 = vperm.xlu0 %1188, %v229_v26   ;;  %v650_v29 = vpack.c.bf16 %v1103_v25, %v1101_v24  ;;  %v228_v30 = vld [vmem:[%s1741_s2] sm:$0xff]  ;;  %v1191_v31 = vld [vmem:[%s1740_s1 + $0x8] sm:$0xff]   ;;  %p1247_p13 = pnand %p1246_p11, %p1752_p12  ;;  %s1251_s6 = scalar_lea.vmem %s1250_s5, 4096 }
  0x3f   : > { %316 = vmatpush1.bf16.msra.mxu0 %v242_v12  ;;  %v231_v32 = vld [vmem:[%s1741_s2 + $0x18] sm:$0xff]  ;;  %v1192_v33 = vld [vmem:[%s1740_s1 + $0x10] sm:$0xff]   ;;  %p1252_p5 = scmp.lt.s32.totalorder %s1694_s13, %s1250_s5  ;;  %p1253_p7 = scmp.lt.s32.totalorder %s1251_s6, %s1245_s3 }
  0x40   : > { %666 = vmatprep.subr.bf16.mxu0 %v653_v18  ;;  %p1248_p4 = pneg %p1247_p13 }
  0x41   : > { %258 = vperm.xlu1 %1189, %v230_v27   ;;  %p1254_p8 = por %p1253_p7, %p1252_p5 }
  0x42   : > { %1094 = vmatmul.mubr.msk.bf16.vlgmr.msra.gmra.mxu0 %vm291_vm0, %v1190_v17  ;;  %268 = vperm.xlu0 %1188, %v232_v28  }
  0x43   : > { %343 = vmatprep.mubr.bf16.mxu0 %v1314_v0  ;;  %667 = vmatpush1.bf16.msra.mxu0 %v652_v21  ;;  %p1255_p10 = pnand %p1254_p8, %p1248_p4 }
  0x44   : > { %668 = vmatprep.subr.bf16.mxu0 %v651_v23 }
  0x45   : > { %248 = vperm.xlu1 %1189, %v228_v30  }
  0x46   : > { %263 = vperm.xlu0 %1188, %v231_v32  }
  0x47   : > { %669 = vmatpush1.bf16.msra.mxu0 %v650_v29 }
  0x4a   : > { %1095 = vmatmul.mubr.msk.bf16.gmra.mxu0 %vm291_vm0, %v1191_v31 }
  0x4b   : > { %353 = vmatprep.mubr.bf16.mxu0 %v1314_v0 }
  0x52   : > { %1096 = vmatmul.mubr.msk.bf16.gmra.mxu0 %vm291_vm0, %v1192_v33 }
  0x53   : > { %686 = vmatprep.mubr.bf16.mxu0 %v1314_v0 }
  0x5a   : > { %1109 = vmatmul.mubr.msk.bf16.vlgmr.msra.gmra.mxu0 %vm291_vm0, %v1190_v17 }
  0x5b   : > { %696 = vmatprep.mubr.bf16.mxu0 %v1314_v0 }
  0x62   : > { %1110 = vmatmul.mubr.msk.bf16.gmra.mxu0 %vm291_vm0, %v1191_v31 }
  0x63   : > { %706 = vmatprep.mubr.bf16.mxu0 %v1314_v0 }
  0x6a   : > { %1111 = vmatmul.mubr.msk.bf16.gmra.mxu0 %vm291_vm0, %v1192_v33 }
  0xb8   : > { %v1505_v34 = vpop.permute.xlu1 %273 }
  0xb9   : > { %v1514_v40 = vpop.permute.xlu0 %253 }
  0xbc   : > { %v1507_v35 = vpop.permute.xlu1 %258 }
  0xbd   : > { %v1531_v55 = vpop.permute.xlu0 %268 }
  0xc0   : > { %v1509_v36 = vpop.permute.xlu1 %248 }
  0xc1   : > { %v1542_v10 = vpop.permute.xlu0 %263 }
 0x102   : > { %v335_v37 = vpop.f32.mrf.mxu0 }
 0x103   : > { %v1512_v38 = vadd.f32 %v335_v37, %v1509_v36 }
 0x104   : > { %v337_v39 = vpop.f32.mrf.mxu0 }
 0x105   : > { %v364_v41 = vmul.f32 %v1512_v38, %v1512_v38  ;;  %v1519_v42 = vadd.f32 %v337_v39, %v1509_v36 }
 0x106   : > { %v339_v43 = vpop.f32.mrf.mxu0 }
 0x107   : > { %v366_v44 = vrot.slane %v364_v41, 4  ;;  %v365_v45 = vmul.f32 %v1519_v42, %v1519_v42  ;;  %v1524_v46 = vadd.f32 %v339_v43, %v1514_v40 }
 0x108   : > { %v341_v47 = vpop.f32.mrf.mxu0 }
 0x109   : > { %v367_v48 = vadd.f32 %v366_v44, %v364_v41  ;;  %v372_v49 = vrot.slane %v365_v45, 4  ;;  %v382_v50 = vmul.f32 %v1524_v46, %v1524_v46  ;;  %v1529_v51 = vadd.f32 %v341_v47, %v1514_v40 }
 0x10a   : > { %v345_v52 = vpop.f32.mrf.mxu0 }
 0x10b   : > { %v368_v53 = vrot.slane %v367_v48, 2  ;;  %v373_v54 = vadd.f32 %v372_v49, %v365_v45  ;;  %v384_v56 = vrot.slane %v382_v50, 4  ;;  %v383_v57 = vmul.f32 %v1529_v51, %v1529_v51 }
 0x10c   : > { %v347_v58 = vpop.f32.mrf.mxu0  ;;  %v1536_v62 = vadd.f32 %v345_v52, %v1507_v35 }
 0x10d   : > { %v374_v59 = vrot.slane %v373_v54, 2  ;;  %v385_v60 = vadd.f32 %v384_v56, %v382_v50  ;;  %v390_v61 = vrot.slane %v383_v57, 4  ;;  %v348_v63 = vadd.f32 %v347_v58, %v1507_v35 }
 0x10e   : > { %v349_v0 = vpop.f32.mrf.mxu0  ;;  %v369_v1 = vadd.f32 %v368_v53, %v367_v48 }
 0x10f   : > { %v375_v2 = vadd.f32 %v374_v59, %v373_v54  ;;  %v386_v3 = vrot.slane %v385_v60, 2  ;;  %v391_v4 = vadd.f32 %v390_v61, %v383_v57  ;;  %v1540_v6 = vadd.f32 %v348_v63, %v1536_v62 }
 0x110   : > { %v351_v5 = vpop.f32.mrf.mxu0  ;;  %v1545_v11 = vadd.f32 %v349_v0, %v1542_v10  ;;  %v370_v14 = vrot.slane %v369_v1, 1 }
 0x111   : > { %v376_v7 = vrot.slane %v375_v2, 1  ;;  %v387_v8 = vadd.f32 %v386_v3, %v385_v60  ;;  %v392_v9 = vrot.slane %v391_v4, 2  ;;  %v352_v12 = vadd.f32 %v351_v5, %v1542_v10 }
 0x112   : > { %v355_v13 = vpop.f32.mrf.mxu0  ;;  %v371_v25 = vadd.f32 %v370_v14, %v369_v1  ;;  %v439_v0 = vpack.c.bf16 %v1545_v11, %v1536_v62 }
 0x113   : > { %v377_v15 = vadd.f32 %v376_v7, %v375_v2  ;;  %v388_v16 = vrot.slane %v387_v8, 1  ;;  %v393_v17 = vadd.f32 %v392_v9, %v391_v4  ;;  %v356_v18 = vadd.f32 %v355_v13, %v1531_v55 }
 0x114   : > { %v357_v19 = vpop.f32.mrf.mxu0  ;;  %v1550_v20 = vadd.f32 %v352_v12, %v1545_v11  ;;  %v440_v43 = vpack.c.bf16 %v352_v12, %v348_v63 }
 0x115   : > { %1193 = vrsqrt.f32 %v377_v15  ;;  %v389_v21 = vadd.f32 %v388_v16, %v387_v8  ;;  %v394_v22 = vrot.slane %v393_v17, 1  ;;  %v358_v23 = vadd.f32 %v357_v19, %v1531_v55 }
 0x116   : > { %v359_v24 = vpop.f32.mrf.mxu0 }
 0x117   : > { %1195 = vrsqrt.f32 %v389_v21  ;;  %v395_v26 = vadd.f32 %v394_v22, %v393_v17  ;;  %v1553_v27 = vadd.f32 %v358_v23, %v356_v18  ;;  %v360_v28 = vadd.f32 %v359_v24, %v1505_v34 }
 0x118   : > { %v361_v29 = vpop.f32.mrf.mxu0 }
 0x119   : > { %1197 = vrsqrt.f32 %v395_v26  ;;  %v362_v30 = vadd.f32 %v361_v29, %v1505_v34  ;;  %v441_v41 = vpack.c.bf16 %v360_v28, %v356_v18 }
 0x11a   : > { %v688_v31 = vpop.f32.mrf.mxu0  ;;  %1199 = vrsqrt.f32 %v371_v25 }
 0x11b   : > { %v1558_v32 = vadd.f32 %v688_v31, %v1509_v36  ;;  %v442_v33 = vpack.c.bf16 %v362_v30, %v358_v23  ;;  %v1560_v37 = vadd.f32 %v362_v30, %v360_v28 }
 0x11c   : > { %v690_v39 = vpop.f32.mrf.mxu0 }
 0x11d   : > { %v717_v44 = vmul.f32 %v1558_v32, %v1558_v32  ;;  %v1565_v45 = vadd.f32 %v690_v39, %v1509_v36  ;;  %455 = vmatprep.subr.bf16.mxu1 %v442_v33 }
 0x11e   : > { %456 = vmatpush1.bf16.xpose.msra.mxu1 %v441_v41  ;;  %v692_v47 = vpop.f32.mrf.mxu0 }
 0x11f   : > { %v719_v48 = vrot.slane %v717_v44, 4  ;;  %v718_v49 = vmul.f32 %v1565_v45, %v1565_v45  ;;  %v1570_v50 = vadd.f32 %v692_v47, %v1514_v40  ;;  %457 = vmatprep.subr.bf16.mxu1 %v440_v43 }
 0x120   : > { %v694_v52 = vpop.f32.mrf.mxu0 }
 0x121   : > { %v720_v53 = vadd.f32 %v719_v48, %v717_v44  ;;  %v725_v54 = vrot.slane %v718_v49, 4  ;;  %v735_v56 = vmul.f32 %v1570_v50, %v1570_v50  ;;  %v1575_v36 = vadd.f32 %v694_v52, %v1514_v40 }
 0x122   : > { %v1194_v57 = vpop.eup %1193  ;;  %v698_v58 = vpop.f32.mrf.mxu0 }
 0x123   : > { %v721_v59 = vrot.slane %v720_v53, 2  ;;  %v726_v60 = vadd.f32 %v725_v54, %v718_v49  ;;  %v737_v61 = vrot.slane %v735_v56, 4  ;;  %v736_v1 = vmul.f32 %v1575_v36, %v1575_v36 }
 0x124   : > { %v1196_v63 = vpop.eup %1195  ;;  %v700_v2 = vpop.f32.mrf.mxu0  ;;  %v1582_v3 = vmul.f32 %v1194_v57, %v1519_v42  ;;  %v1586_v12 = vadd.f32 %v698_v58, %v1507_v35 }
 0x125   : > { %v722_v4 = vadd.f32 %v721_v59, %v720_v53  ;;  %v727_v5 = vrot.slane %v726_v60, 2  ;;  %v738_v7 = vadd.f32 %v737_v61, %v735_v56  ;;  %v398_v8 = vmul.f32 %v1196_v63, %v1524_v46 }
 0x126   : > { %v1198_v40 = vpop.eup %1197  ;;  %v743_v9 = vrot.slane %v736_v1, 4  ;;  %v1589_v13 = vadd.f32 %v700_v2, %v1507_v35  ;;  %458 = vmatpush1.bf16.xpose.msra.mxu1 %v439_v0  ;;  %v702_v62 = vpop.f32.mrf.mxu0 }
 0x127   : > { %v723_v11 = vrot.slane %v722_v4, 1  ;;  %v728_v14 = vadd.f32 %v727_v5, %v726_v60  ;;  %v739_v15 = vrot.slane %v738_v7, 2  ;;  %v1592_v42 = vadd.f32 %v702_v62, %v1542_v10  ;;  %558 = vmatprep.subr.mxu1 %v1582_v3  ;;  %v1200_v16 = vpop.eup %1199 }
 0x128   : > { %v744_v17 = vadd.f32 %v743_v9, %v736_v1  ;;  %v704_v46 = vpop.f32.mrf.mxu0  ;;  %v399_v18 = vmul.f32 %v1198_v40, %v1529_v51  ;;  %v1598_v19 = vadd.f32 %v1589_v13, %v1586_v12  ;;  %v1606_v30 = vmul.f32 %v1200_v16, %v1512_v38 }
 0x129   : > { %v724_v35 = vadd.f32 %v723_v11, %v722_v4  ;;  %v729_v21 = vrot.slane %v728_v14, 1  ;;  %v740_v22 = vadd.f32 %v739_v15, %v738_v7  ;;  %v791_v23 = vpack.c.bf16 %v1592_v42, %v1586_v12 }
 0x12a   : > { %v745_v24 = vrot.slane %v744_v17, 2  ;;  %v1603_v25 = vadd.f32 %v704_v46, %v1542_v10  ;;  %v708_v26 = vpop.f32.mrf.mxu0  ;;  %v438_v28 = vpack.c.bf16 %v399_v18, %v399_v18  ;;  %v400_v29 = vadd.f32 %v399_v18, %v398_v8 }
 0x12b   : > { %v730_v51 = vadd.f32 %v729_v21, %v728_v14  ;;  %v741_v31 = vrot.slane %v740_v22, 1  ;;  %v437_v33 = vpack.c.bf16 %v398_v8, %v398_v8  ;;  %1201 = vrsqrt.f32 %v724_v35 }
 0x12c   : > { %v746_v39 = vadd.f32 %v745_v24, %v744_v17  ;;  %v792_v41 = vpack.c.bf16 %v1603_v25, %v1589_v13  ;;  %475 = vmatprep.mubr.bf16.mxu1 %v438_v28  ;;  %v710_v43 = vpop.f32.mrf.mxu0  ;;  %v780_v10 = vadd.f32 %v1603_v25, %v1592_v42  ;;  %v709_v47 = vadd.f32 %v708_v26, %v1531_v55 }
 0x12d   : > { %1203 = vrsqrt.f32 %v730_v51  ;;  %v742_v44 = vadd.f32 %v741_v31, %v740_v22  ;;  %v711_v38 = vadd.f32 %v710_v43, %v1531_v55  ;;  %476 = vmatmul.mubr.bf16.vlgmr.msra.gmra.mxu1 %v437_v33  ;;  %v1315_v7 = vmov 0.0  }
 0x12e   : > { %v747_v48 = vrot.slane %v746_v39, 1  ;;  %559 = vmatpush1.msra.mxu1 %v1606_v30  ;;  %v712_v49 = vpop.f32.mrf.mxu0  ;;  %592 = vmatprep.mubr.f32.mxu1 %v1315_v7 }
 0x12f   : > { %v713_v52 = vadd.f32 %v712_v49, %v1505_v34  ;;  %v1616_v53 = vadd.f32 %v711_v38, %v709_v47  ;;  %1205 = vrsqrt.f32 %v742_v44  ;;  %943 = vmatprep.mubr.f32.mxu0 %v1315_v7 }
 0x130   : > { %v748_v54 = vadd.f32 %v747_v48, %v746_v39  ;;  %v714_v56 = vpop.f32.mrf.mxu0 }
 0x131   : > { %v793_v57 = vpack.c.bf16 %v713_v52, %v709_v47  ;;  %v715_v58 = vadd.f32 %v714_v56, %v1505_v34 }
 0x132   : > { %1207 = vrsqrt.f32 %v748_v54 }
 0x133   : > { %v794_v59 = vpack.c.bf16 %v715_v58, %v711_v38  ;;  %v786_v60 = vadd.f32 %v715_v58, %v713_v52 }
 0x135   : > { %807 = vmatprep.subr.bf16.mxu1 %v794_v59 }
 0x138   : > { %v1202_v55 = vpop.eup %1201 }
 0x139   : > { %v1623_v0 = vmul.f32 %v1202_v55, %v1558_v32 }
 0x13a   : > { %v1204_v61 = vpop.eup %1203 }
 0x13b   : > { %v1620_v63 = vmul.f32 %v1204_v61, %v1565_v45 }
 0x13c   : > { %v1206_v1 = vpop.eup %1205 }
 0x13d   : > { %909 = vmatprep.subr.mxu0 %v1620_v63  ;;  %v751_v34 = vmul.f32 %v1206_v1, %v1570_v50 }
 0x13e   : > { %910 = vmatpush1.msra.mxu0 %v1623_v0 }
 0x13f   : > { %v1208_v2 = vpop.eup %1207  ;;  %v789_v9 = vpack.c.bf16 %v751_v34, %v751_v34 }
 0x140   : > { %v752_v4 = vmul.f32 %v1208_v2, %v1575_v36 }
 0x142   : > { %v1629_v5 = vadd.f32 %v752_v4, %v751_v34 }
 0x1ed   : > { %v477_v45 = vpop.f32.mrf.mxu1 }
 0x1ee   : > { %483 = vxpose.xlu0.b32.start.end [1/1] (short) (narrow) %v477_v45, 32 }
 0x1ef   : > { %v479_v32 = vpop.f32.mrf.mxu1 }
 0x1f1   : > { %v480_v40 = vpop.f32.mrf.mxu1 }
 0x1f3   : > { %v481_v8 = vpop.f32.mrf.mxu1 }
 0x227   : > { %401 = vadd.xlane.f32.xlu0 %v400_v29  ;;  %v1651_v29 = vstv %s221_s11 }
 0x22b   : > { %426 = vadd.xlane.f32.xlu0 %v1540_v6 }
 0x22f   : > { %429 = vadd.xlane.f32.xlu0 %v1550_v20 }
 0x233   : > { %435 = vadd.xlane.f32.xlu0 %v1560_v37  ;;  %v790_v37 = vpack.c.bf16 %v752_v4, %v752_v4 }
 0x237   : > { %781 = vadd.xlane.f32.xlu0 %v780_v10 }
 0x23b   : > { %787 = vadd.xlane.f32.xlu0 %v786_v60 }
 0x26a   : > { %v499_v50 = vpop.trf.xlu0 }
 0x26b   : > { %1097 = vmatmul.mubr.msk.f32.vlgmr.msra.gmra.mxu1 %vm515_vm1, %v499_v50 }
 0x26c   : > { %808 = vmatpush1.bf16.xpose.msra.mxu1 %v793_v57  ;;  %598 = vmatprep.mubr.f32.mxu1 %v1315_v7 }
 0x26d   : > { %809 = vmatprep.subr.bf16.mxu1 %v792_v41 }
 0x26e   : > { %v500_v36 = vpop.trf.xlu0 }
 0x26f   : > { %1098 = vmatmul.mubr.msk.f32.gmra.mxu1 %vm515_vm1, %v500_v36 }
 0x270   : > { %604 = vmatprep.mubr.f32.mxu1 %v1315_v7 }
 0x272   : > { %v501_v6 = vpop.trf.xlu0 }
 0x273   : > { %1099 = vmatmul.mubr.msk.f32.gmra.mxu1 %vm515_vm1, %v501_v6 }
 0x274   : > { %810 = vmatpush1.bf16.xpose.msra.mxu1 %v791_v23  ;;  %610 = vmatprep.mubr.f32.mxu1 %v1315_v7 }
 0x275   : > { %1134 = vmatprep.subr.mxu1 %v1620_v63 }
 0x276   : > { %v502_v20 = vpop.trf.xlu0 }
 0x277   : > { %1100 = vmatmul.mubr.msk.f32.gmra.mxu1 %vm515_vm1, %v502_v20 }
 0x278   : > { %827 = vmatprep.mubr.bf16.mxu1 %v790_v37 }
 0x27b   : > { %828 = vmatmul.mubr.bf16.vlgmr.msra.gmra.mxu1 %v789_v9 }
 0x27c   : > { %1135 = vmatpush1.msra.mxu1 %v1623_v0  ;;  %949 = vmatprep.mubr.f32.mxu1 %v1315_v7 }
 0x2b0   : > { %v402_v13 = vpop.xlane.xlu0 %401 }
 0x2b1   : > { %v403_v62 = vadd.f32 1e-06, %v402_v13 }
 0x2b3   : > { %v404_v12 = vmul.f32 %v403_v62, %v1606_v30  ;;  %v405_v11 = vmul.f32 %v403_v62, %v1582_v3 }
 0x2b4   : > { %v427_v3 = vpop.xlane.xlu0 %426 }
 0x2b5   : > { %v406_v14 = vrot.slane %v404_v12, 4  ;;  %v412_v15 = vrot.slane %v405_v11, 4 }
 0x2b7   : > { %v407_v42 = vadd.f32 %v406_v14, %v404_v12  ;;  %v413_v16 = vadd.f32 %v412_v15, %v405_v11 }
 0x2b8   : > { %v430_v44 = vpop.xlane.xlu0 %429 }
 0x2b9   : > { %v408_v17 = vrot.slane %v407_v42, 2  ;;  %v414_v46 = vrot.slane %v413_v16, 2 }
 0x2bb   : > { %v409_v18 = vadd.f32 %v408_v17, %v407_v42  ;;  %v415_v35 = vadd.f32 %v414_v46, %v413_v16 }
 0x2bc   : > { %v436_v59 = vpop.xlane.xlu0 %435 }
 0x2bd   : > { %v410_v21 = vrot.slane %v409_v18, 1  ;;  %v416_v22 = vrot.slane %v415_v35, 1 }
 0x2bf   : > { %v411_v23 = vadd.f32 %v410_v21, %v409_v18  ;;  %v417_v24 = vadd.f32 %v416_v22, %v415_v35 }
 0x2c1   : > { %v418_v25 = vadd.f32 256.0, %v411_v23  ;;  %v419_v26 = vadd.f32 256.0, %v417_v24 }
 0x2c3   : > { %1209 = vrcp.f32 %v418_v25 }
 0x2c4   : > { %1211 = vrcp.f32 %v419_v26 }
 0x2d0   : > { %v1210_v28 = vpop.eup %1209 }
 0x2d1   : > { %v1212_v30 = vpop.eup %1211  ;;  %v423_v31 = vmul.f32 %v1210_v28, %v1651_v29 }
 0x2d2   : > { %v424_v43 = vmul.f32 %v1212_v30, %v1651_v29 }
 0x32b   : > { %v594_v51 = vpop.f32.mrf.mxu1 }
 0x32c   : > { %v617_v33 = vadd.f32 %v594_v51, %v427_v3 }
 0x32d   : > { %v596_v39 = vpop.f32.mrf.mxu1 }
 0x32e   : > { %v625_v41 = vmul.f32 %v617_v33, %v423_v31  ;;  %v618_v10 = vadd.f32 %v596_v39, %v427_v3  ;;  %v782_v33 = vpop.xlane.xlu0 %781 }
 0x32f   : > { %v600_v47 = vpop.f32.mrf.mxu1 }
 0x330   : > { %633 = vst [vmem:[%s1657_s12] sm:$0xff] %v625_v41  ;;  %v626_v38 = vmul.f32 %v618_v10, %v424_v43  ;;  %v619_v48 = vadd.f32 %v600_v47, %v430_v44 }
 0x331   : > { %v602_v49 = vpop.f32.mrf.mxu1 }
 0x332   : > { %634 = vst [vmem:[%s1657_s12 + $0x8] sm:$0xff] %v626_v38  ;;  %v627_v52 = vmul.f32 %v619_v48, %v423_v31  ;;  %v620_v54 = vadd.f32 %v602_v49, %v430_v44 }
 0x333   : > { %v606_v56 = vpop.f32.mrf.mxu1 }
 0x334   : > { %635 = vst [vmem:[%s1657_s12 + $0x10] sm:$0xff] %v627_v52  ;;  %v628_v57 = vmul.f32 %v620_v54, %v424_v43 }
 0x335   : > { %v608_v58 = vpop.f32.mrf.mxu1 }
 0x336   : > { %636 = vst [vmem:[%s1657_s12 + $0x18] sm:$0xff] %v628_v57  ;;  %v788_v57 = vpop.xlane.xlu0 %787 }
 0x337   : > { %v612_v60 = vpop.f32.mrf.mxu1 }
 0x338   : > { %v623_v55 = vadd.f32 %v612_v60, %v436_v59 }
 0x339   : > { %v614_v61 = vpop.f32.mrf.mxu1 }
 0x33a   : > { %v631_v1 = vmul.f32 %v623_v55, %v423_v31  ;;  %v624_v2 = vadd.f32 %v614_v61, %v436_v59 }
 0x33b   : > { %v829_v34 = vpop.f32.mrf.mxu1 }
 0x33c   : > { %639 = vst [vmem:[%s1657_s12 + $0x30] sm:$0xff] %v631_v1  ;;  %v632_v4 = vmul.f32 %v624_v2, %v424_v43  ;;  %835 = vxpose.xlu1.b32.start.end [1/1] (short) (narrow) %v829_v34, 32 }
 0x33d   : > { %v831_v45 = vpop.f32.mrf.mxu1 }
 0x33e   : > { %640 = vst [vmem:[%s1657_s12 + $0x38] sm:$0xff] %v632_v4 }
 0x33f   : > { %v832_v32 = vpop.f32.mrf.mxu1 }
 0x341   : > { %v833_v40 = vpop.f32.mrf.mxu1 }
 0x36f   : > { %754 = vadd.xlane.f32.xlu1 %v1629_v5 }
 0x373   : > { %432 = vadd.xlane.f32.xlu1 %v1553_v27 }
 0x377   : > { %778 = vadd.xlane.f32.xlu1 %v1598_v19 }
 0x37b   : > { %784 = vadd.xlane.f32.xlu1 %v1616_v53 }
 0x3b8   : > { %v851_v8 = vpop.trf.xlu1 }
 0x3b9   : > { %1112 = vmatmul.mubr.msk.f32.vlgmr.msra.gmra.mxu0 %vm515_vm1, %v851_v8 }
 0x3bc   : > { %v852_v50 = vpop.trf.xlu1 }
 0x3bd   : > { %1113 = vmatmul.mubr.msk.f32.vlgmr.msra.gmra.mxu1 %vm515_vm1, %v852_v50 }
 0x3be   : > { %955 = vmatprep.mubr.f32.mxu1 %v1315_v7 }
 0x3c0   : > { %v853_v36 = vpop.trf.xlu1 }
 0x3c1   : > { %1114 = vmatmul.mubr.msk.f32.gmra.mxu1 %vm515_vm1, %v853_v36 }
 0x3c2   : > { %961 = vmatprep.mubr.f32.mxu1 %v1315_v7 }
 0x3c4   : > { %v854_v27 = vpop.trf.xlu1 }
 0x3c5   : > { %1115 = vmatmul.mubr.msk.f32.gmra.mxu1 %vm515_vm1, %v854_v27 }
 0x3f8   : > { %v755_v19 = vpop.xlane.xlu1 %754 }
 0x3f9   : > { %v756_v9 = vadd.f32 1e-06, %v755_v19 }
 0x3fb   : > { %v757_v13 = vmul.f32 %v756_v9, %v1623_v0  ;;  %v758_v62 = vmul.f32 %v756_v9, %v1620_v63 }
 0x3fc   : > { %v433_v53 = vpop.xlane.xlu1 %432 }
 0x3fd   : > { %v621_v5 = vadd.f32 %v606_v56, %v433_v53  ;;  %v622_v6 = vadd.f32 %v608_v58, %v433_v53  ;;  %v759_v12 = vrot.slane %v757_v13, 4  ;;  %v765_v11 = vrot.slane %v758_v62, 4 }
 0x3ff   : > { %v629_v20 = vmul.f32 %v621_v5, %v423_v31  ;;  %v630_v37 = vmul.f32 %v622_v6, %v424_v43  ;;  %v760_v14 = vadd.f32 %v759_v12, %v757_v13  ;;  %v766_v7 = vadd.f32 %v765_v11, %v758_v62 }
 0x400   : > { %v779_v24 = vpop.xlane.xlu1 %778 }
 0x401   : > { %637 = vst [vmem:[%s1657_s12 + $0x20] sm:$0xff] %v629_v20  ;;  %638 = vst [vmem:[%s1657_s12 + $0x28] sm:$0xff] %v630_v37  ;;  %v761_v15 = vrot.slane %v760_v14, 2  ;;  %v767_v42 = vrot.slane %v766_v7, 2 }
 0x403   : > { %v762_v16 = vadd.f32 %v761_v15, %v760_v14  ;;  %v768_v17 = vadd.f32 %v767_v42, %v766_v7 }
 0x404   : > { %v785_v38 = vpop.xlane.xlu1 %784 }
 0x405   : > { %v763_v46 = vrot.slane %v762_v16, 1  ;;  %v769_v18 = vrot.slane %v768_v17, 1 }
 0x407   : > { %v764_v35 = vadd.f32 %v763_v46, %v762_v16  ;;  %v770_v21 = vadd.f32 %v769_v18, %v768_v17 }
 0x409   : > { %v771_v22 = vadd.f32 256.0, %v764_v35  ;;  %v772_v23 = vadd.f32 256.0, %v770_v21 }
 0x40b   : > { %1213 = vrcp.f32 %v771_v22 }
 0x40c   : > { %1215 = vrcp.f32 %v772_v23 }
 0x418   : > { %v1214_v0 = vpop.eup %1213 }
 0x419   : > { %v1216_v63 = vpop.eup %1215  ;;  %v775_v26 = vmul.f32 %v1214_v0, %v1651_v29 }
 0x41a   : > { %v776_v51 = vmul.f32 %v1216_v63, %v1651_v29 }
 0x479   : > { %v945_v25 = vpop.f32.mrf.mxu0 }
 0x47a   : > { %v968_v28 = vadd.f32 %v945_v25, %v779_v24 }
 0x47b   : > { %v947_v3 = vpop.f32.mrf.mxu0 }
 0x47c   : > { %v976_v30 = vmul.f32 %v968_v28, %v775_v26  ;;  %v969_v31 = vadd.f32 %v947_v3, %v779_v24 }
 0x47d   : > { %v951_v39 = vpop.f32.mrf.mxu1 }
 0x47e   : > { %1116 = vst [vmem:[%s1657_s12 + $0x40] sm:$0xff] %v976_v30  ;;  %v977_v41 = vmul.f32 %v969_v31, %v776_v51  ;;  %v970_v43 = vadd.f32 %v951_v39, %v782_v33 }
 0x47f   : > { %v953_v10 = vpop.f32.mrf.mxu1 }
 0x480   : > { %1117 = vst [vmem:[%s1657_s12 + $0x48] sm:$0xff] %v977_v41  ;;  %v978_v44 = vmul.f32 %v970_v43, %v775_v26  ;;  %v971_v47 = vadd.f32 %v953_v10, %v782_v33 }
 0x481   : > { %v957_v48 = vpop.f32.mrf.mxu1 }
 0x482   : > { %1118 = vst [vmem:[%s1657_s12 + $0x50] sm:$0xff] %v978_v44  ;;  %v979_v49 = vmul.f32 %v971_v47, %v776_v51  ;;  %v972_v29 = vadd.f32 %v957_v48, %v785_v38 }
 0x483   : > { %v959_v52 = vpop.f32.mrf.mxu1 }
 0x484   : > { %1119 = vst [vmem:[%s1657_s12 + $0x58] sm:$0xff] %v979_v49  ;;  %v980_v54 = vmul.f32 %v972_v29, %v775_v26  ;;  %v973_v56 = vadd.f32 %v959_v52, %v785_v38 }
 0x485   : > { %v963_v58 = vpop.f32.mrf.mxu1 }
 0x486   : > { %1120 = vst [vmem:[%s1657_s12 + $0x60] sm:$0xff] %v980_v54  ;;  %v981_v59 = vmul.f32 %v973_v56, %v776_v51  ;;  %v974_v60 = vadd.f32 %v963_v58, %v788_v57 }
 0x487   : > { %v965_v55 = vpop.f32.mrf.mxu1 }
 0x488   : > { %1121 = vst [vmem:[%s1657_s12 + $0x68] sm:$0xff] %v981_v59  ;;  %v982_v61 = vmul.f32 %v974_v60, %v775_v26  ;;  %v975_v1 = vadd.f32 %v965_v55, %v788_v57 }
 0x48a   : > { %1122 = vst [vmem:[%s1657_s12 + $0x70] sm:$0xff] %v982_v61  ;;  %v983_v2 = vmul.f32 %v975_v1, %v776_v51 }
 0x48c   : > { %1123 = vst [vmem:[%s1657_s12 + $0x78] sm:$0xff] %v983_v2 }
 0x48d   : > { %1258 = shalt.err (!%p1255_p10)
}
 0x48e   : > { %s1259_s7 = scalar_lea.hbm %s1692_s24, 2048  ;;  %s1263_s16 = scalar_lea.hbm %s1743_s4, 4096 }
 0x48f   : > { %p1260_p0 = scmp.ne.s32.totalorder %s1692_s24, %s1259_s7  ;;  %p1264_p1 = scmp.lt.s32.totalorder %s1692_s24, %s1743_s4 }
 0x490   : > { %p1265_p3 = scmp.lt.s32.totalorder %s1263_s16, %s1259_s7 }
 0x491   : > { %p1261_p2 = pnand %p1260_p0, %p1752_p12 }
 0x492   : > { %p1266_p6 = por %p1265_p3, %p1264_p1 }
 0x493   : > { %p1262_p9 = pneg %p1261_p2 }
 0x495   : > { %p1267_p11 = pnand %p1266_p6, %p1262_p9 }
 0x497   : > { %1270 = shalt.err (!%p1267_p11)
}
 0x498   : > { %s1317_s11 = smov 256   ;;  %s1318_s12 = smov 16  }
 0x499   : > { %1138 = dma.vmem_to_hbm [thread:$0]  (%p1752_p12), %s1694_s13, 2048, %s1692_s24, %s994_s26, %s1317_s11, %s1317_s11, %s1318_s12  }
 0x49a PF: > { %s1023_s14 = sand.u32 1, %s1297_s17   ;;  %p1753_p13 = scmp.ne.s32.totalorder %s1749_s29, 0 }
 0x49b   : > { %p1754_p4 = scmp.ge.s32.totalorder %s1309_s20, 2  ;;  %s1024_s21 = scalar_lea.sflag [#allocation5], %s1023_s14 }
 0x49d   : > { %p1145_p5 = pnand %p1754_p4, %p1753_p13 }
 0x49f   : > { %p1146_p7 = pneg %p1145_p5 }
 0x4a1   : > { %1292 = dma.done.wait (%p1146_p7), %s1024_s21, 2048  }
 0x4a2   : > { %1294 = vsyncadd (%p1146_p7), %s1024_s21, 4294965248  ;;  %p18_p8 = scmp.ge.s32.totalorder %s1372_s22, 4   ;;  %s1755_s17 = smov %s1301_s18 }
 0x4a3   : > { %s1756_s18 = smov %s1305_s19  ;;  %s1757_s19 = smov %s1384_s25 }
 0x4a4   : > { %s1758_s20 = smov %s1372_s22  ;;  %20 = sbr.rel (!%p18_p8) target bundleno = 7 (0x7), region = 83 }
 0x4a9   :  { %1029 = vsyncpa [#allocation4], 1 }
 0x4aa   :  { %1031 = vsyncpa [#allocation4 + $0x1], 1 }
 0x4ab   :  { %1032 = vsyncpa [#allocation5], 1 }
 0x4ac   :  { %1034 = vsyncpa [#allocation5 + $0x1], 1 }

</bundles_post_ra>
